<compile_context>
chip_gen: v6e
topology: v6e:2x2x1
jax: 0.10.0
libtpu: 0.0.40
codegen_flags: <defaults>
</compile_context>

<pallas_src>
import jax
import jax.numpy as jnp
from jax.experimental import pallas as pl
from jax.experimental.pallas import tpu as pltpu

embedding_dim = 200
layer_size = 60
num_of_hidden_layer = 5
p = 4
s = 4
WINDOW = p + 1 + s  # 9 tokens per example


def _round_up(x, m):
    return ((x + m - 1) // m) * m


def _fused_kernel(idx_ref, t_ref, wh_ref, bh_ref, wl_ref, bl_ref, o_ref):
    """One batch tile of the whole forward pass.

    idx_ref: (TB, WINDOW) int32 token ids
    t_ref  : (WINDOW*VP, HP) bf16 folded per-position tables (emb@W0_k, b0 in block 0)
    wh_ref : (NH, HP, HP) stacked hidden weights (resident)
    bh_ref : (NH, 1, HP) stacked hidden biases
    wl_ref : (HP, OP) output weight, bl_ref: (1, OP) output bias
    o_ref  : (TB, output_size) logits (narrow, unpadded lanes)
    """
    tb, window = idx_ref.shape
    kdim, hp = t_ref.shape
    vp = kdim // window

    idx = idx_ref[...]                                           # (TB, W) int32
    lanes = jax.lax.broadcasted_iota(jnp.int32, (tb, vp), 1)     # (TB, VP) int32

    # One-hot for all 9 positions, laid side by side along lanes -> (TB, W*VP) bf16.
    # Compares stay in int32 (native VPU on v5e); one cast per 128-lane slab, then a
    # lane-aligned concatenate (pure vreg placement).
    cols = [(lanes == idx[:, k:k + 1]).astype(jnp.bfloat16) for k in range(window)]
    onehot = jnp.concatenate(cols, axis=-1)                      # (TB, W*VP) bf16

    # Folded embedding + first Linear (+ its bias) as ONE MXU matmul, then tanh.
    h = jnp.tanh(jnp.dot(onehot, t_ref[...],
                         preferred_element_type=jnp.float32))    # (TB, HP) f32

    # Hidden 60->60 layers (padded to 128x128), tanh after each (unrolled, NH = 4).
    for i in range(wh_ref.shape[0]):
        h = jnp.tanh(jnp.dot(h, wh_ref[i], preferred_element_type=jnp.float32)
                     + bh_ref[i])

    # Final projection; store only the real output lanes (narrow HBM writeback).
    logits = jnp.dot(h, wl_ref[...], preferred_element_type=jnp.float32) + bl_ref[...]
    o_ref[...] = logits[:, :o_ref.shape[1]]


def pos_tagger_forward(word_index, emb_table, weights, biases, output_size,
                       *, tile_b=2048):
    """Forward pass equivalent to POS_Tagger.forward.

    word_index: (B, WINDOW) int32
    emb_table : (vocab, embedding_dim) f32
    weights   : list of (din, dout) f32 (transposed vs. PyTorch nn.Linear)
    biases    : list of (dout,) f32
    returns   : (B, output_size) f32 logits
    """
    assert len(weights) == len(biases) and len(weights) >= 3
    B = word_index.shape[0]
    vocab = emb_table.shape[0]
    f32 = jnp.float32

    HP = _round_up(layer_size, 128)     # 60 -> 128 (hidden width, lanes)
    VP = _round_up(vocab, 128)          # 97 -> 128 (one-hot block / MXU K dim)
    OP = _round_up(output_size, 128)    # 12 -> 128 (lane-dense final matmul)

    # ---- batch tiling ----
    TB = min(_round_up(tile_b, 8), _round_up(B, 8))
    # v7x has 2 TensorCores: keep >= 2 grid steps whenever the batch allows it so the
    # "parallel" batch axis lands work on both cores (no-op for single-TC v5e/v6e).
    TB = min(TB, max(8, _round_up((B + 1) // 2, 8)))
    B_pad = _round_up(B, TB)
    grid = (B_pad // TB,)

    # ---- fold embedding + first Linear (+ its bias) into one (W*VP, HP) bf16 table ----
    hi = jax.lax.Precision.HIGHEST
    w0 = weights[0].astype(f32)                                   # (W*D, 60)
    t = jnp.stack(
        [jnp.dot(emb_table.astype(f32),
                 w0[k * embedding_dim:(k + 1) * embedding_dim, :],
                 precision=hi)
         for k in range(WINDOW)], axis=0)                         # (W, vocab, 60)
    t = t.at[0].add(biases[0].astype(f32))                        # exact: one row of T_0 per example
    t_p = jnp.pad(t, ((0, 0), (0, VP - vocab), (0, HP - layer_size)))
    t2_p = t_p.reshape(WINDOW * VP, HP).astype(jnp.bfloat16)      # (1152, 128) bf16

    # ---- stacked hidden layers (resident f32) ----
    n_hidden = len(weights) - 2
    wh = jnp.stack([w.astype(f32) for w in weights[1:-1]], axis=0)        # (NH, 60, 60)
    bh = jnp.stack([b.astype(f32) for b in biases[1:-1]], axis=0)
    bh = bh.reshape(n_hidden, 1, layer_size)
    wh_p = jnp.pad(wh, ((0, 0), (0, HP - layer_size), (0, HP - layer_size)))
    bh_p = jnp.pad(bh, ((0, 0), (0, 0), (0, HP - layer_size)))

    # ---- output layer ----
    wl_p = jnp.pad(weights[-1].astype(f32),
                   ((0, HP - layer_size), (0, OP - output_size)))
    bl_p = jnp.pad(biases[-1].astype(f32).reshape(1, -1),
                   ((0, 0), (0, OP - output_size)))

    # ---- token ids, padded along batch (pad rows use token 0, sliced off below) ----
    idx_p = jnp.pad(word_index.astype(jnp.int32), ((0, B_pad - B), (0, 0)))

    # Scoped-VMEM limit sized to the real footprint (the bf16 one-hot temp dominates at
    # large TB); v5e's default scoped limit is only 16 MiB, v7x physical VMEM is 64 MiB.
    est = (6 * TB * WINDOW * VP                      # bf16 one-hot + temp headroom
           + 16 * TB * HP + 16 * TB * 128            # f32 activations, id/out blocks (x2 buf)
           + 2 * (2 * WINDOW * VP * HP + 4 * n_hidden * HP * HP + 4 * HP * OP)
           + (4 << 20))                              # slack
    vmem_limit = int(min(64 << 20, max(32 << 20, est)))

    out = pl.pallas_call(
        _fused_kernel,
        out_shape=jax.ShapeDtypeStruct((B_pad, output_size), f32),
        grid=grid,
        in_specs=[
            pl.BlockSpec((TB, WINDOW), lambda i: (i, 0)),            # per-tile ids
            pl.BlockSpec((WINDOW * VP, HP), lambda i: (0, 0)),       # resident folded table
            pl.BlockSpec((n_hidden, HP, HP), lambda i: (0, 0, 0)),   # resident hidden weights
            pl.BlockSpec((n_hidden, 1, HP), lambda i: (0, 0, 0)),
            pl.BlockSpec((HP, OP), lambda i: (0, 0)),
            pl.BlockSpec((1, OP), lambda i: (0, 0)),
        ],
        out_specs=pl.BlockSpec((TB, output_size), lambda i: (i, 0)),  # narrow output
        compiler_params=pltpu.CompilerParams(
            dimension_semantics=("parallel",),
            vmem_limit_bytes=vmem_limit),
    )(idx_p, t2_p, wh_p, bh_p, wl_p, bl_p)

    return out[:B]


def _reference_forward(word_index, emb_table, weights, biases):
    """Pure-JAX reference mirroring the PyTorch module exactly."""
    emb = jnp.take(emb_table, word_index, axis=0)
    h = emb.reshape(word_index.shape[0], embedding_dim * WINDOW)
    n = len(weights)
    for i, (w, b) in enumerate(zip(weights, biases)):
        h = h @ w + b
        if i < n - 1:
            h = jnp.tanh(h)
    return h


if __name__ == "__main__":
    key = jax.random.PRNGKey(0)
    vocab_size = 97
    output_size = 12

    k_emb, k_idx, k_idx2, k_idx3, k_params = jax.random.split(key, 5)

    emb_table = 0.1 * jax.random.normal(
        k_emb, (vocab_size, embedding_dim), jnp.float32
    )

    # Linear layer dims: 1800 -> 60 -> 60 -> 60 -> 60 -> 60 -> output_size
    dims = [embedding_dim * WINDOW] + [layer_size] * num_of_hidden_layer + [output_size]
    weights, biases = [], []
    kp = k_params
    for i in range(len(dims) - 1):
        kp, kw, kb = jax.random.split(kp, 3)
        bound = 1.0 / (dims[i] ** 0.5)
        weights.append(
            jax.random.uniform(kw, (dims[i], dims[i + 1]), jnp.float32, -bound, bound)
        )
        biases.append(
            jax.random.uniform(kb, (dims[i + 1],), jnp.float32, -bound, bound)
        )

    # --- small single-tile case (B=8, grid=(1,)) ---
    B = 8
    word_index = jax.random.randint(k_idx, (B, WINDOW), 0, vocab_size, jnp.int32)
    out = pos_tagger_forward(word_index, emb_table, weights, biases, output_size)
    out = jax.block_until_ready(out)
    ref = _reference_forward(word_index, emb_table, weights, biases)
    assert out.shape == (B, output_size)
    assert jnp.allclose(out, ref, atol=2e-3, rtol=2e-3), "mismatch vs reference (B=8)"

    # --- multi-tile case exercising the pipelined batch grid (B=24, TB=8 -> grid=(3,)) ---
    B2 = 24
    word_index2 = jax.random.randint(k_idx2, (B2, WINDOW), 0, vocab_size, jnp.int32)
    out2 = pos_tagger_forward(word_index2, emb_table, weights, biases, output_size,
                              tile_b=8)
    out2 = jax.block_until_ready(out2)
    ref2 = _reference_forward(word_index2, emb_table, weights, biases)
    assert out2.shape == (B2, output_size)
    assert jnp.allclose(out2, ref2, atol=2e-3, rtol=2e-3), "mismatch vs reference (B=24)"

    # --- default tile_b: exercises the 2-step (two-TensorCore) tile cap + batch padding ---
    B3 = 40
    word_index3 = jax.random.randint(k_idx3, (B3, WINDOW), 0, vocab_size, jnp.int32)
    out3 = pos_tagger_forward(word_index3, emb_table, weights, biases, output_size)
    out3 = jax.block_until_ready(out3)
    ref3 = _reference_forward(word_index3, emb_table, weights, biases)
    assert out3.shape == (B3, output_size)
    assert jnp.allclose(out3, ref3, atol=2e-3, rtol=2e-3), "mismatch vs reference (B=40)"

    print("KERNEL_OK")
</pallas_src>

<mosaic_0001>
module attributes {stable_mosaic.version = 11 : i64} {
  func.func @_fused_kernel(%arg0: i32, %arg1: memref<8x9xi32, #tpu.memory_space<vmem>>, %arg2: memref<1152x128xbf16, #tpu.memory_space<vmem>>, %arg3: memref<4x128x128xf32, #tpu.memory_space<vmem>>, %arg4: memref<4x1x128xf32, #tpu.memory_space<vmem>>, %arg5: memref<128x128xf32, #tpu.memory_space<vmem>>, %arg6: memref<1x128xf32, #tpu.memory_space<vmem>>, %arg7: memref<8x12xf32, #tpu.memory_space<vmem>>) attributes {dimension_semantics = [#tpu.dimension_semantics<parallel>], iteration_bounds = array<i64: 1>, scalar_prefetch = 0 : i64, scratch_operands = 0 : i64, tpu.core_type = #tpu.core_type<tc>, window_params = [{transform_indices = @transform_0, window_bounds = array<i64: 8, 9>}, {pipeline_mode = #tpu.pipeline_mode<synchronous>, transform_indices = @transform_1, window_bounds = array<i64: 1152, 128>}, {pipeline_mode = #tpu.pipeline_mode<synchronous>, transform_indices = @transform_2, window_bounds = array<i64: 4, 128, 128>}, {pipeline_mode = #tpu.pipeline_mode<synchronous>, transform_indices = @transform_3, window_bounds = array<i64: 4, 1, 128>}, {pipeline_mode = #tpu.pipeline_mode<synchronous>, transform_indices = @transform_4, window_bounds = array<i64: 128, 128>}, {pipeline_mode = #tpu.pipeline_mode<synchronous>, transform_indices = @transform_5, window_bounds = array<i64: 1, 128>}, {transform_indices = @transform_6, window_bounds = array<i64: 8, 12>}]} {
    %c0 = arith.constant 0 : index
    %c0_0 = arith.constant 0 : index
    %0 = vector.load %arg1[%c0, %c0_0] : memref<8x9xi32, #tpu.memory_space<vmem>>, vector<8x9xi32>
    %1 = tpu.iota {dimensions = array<i32: 1>} : vector<8x128xi32>
    %2 = vector.extract_strided_slice %0 {offsets = [0, 0], sizes = [8, 1], strides = [1, 1]} : vector<8x9xi32> to vector<8x1xi32>
    %3 = vector.broadcast %2 : vector<8x1xi32> to vector<8x128xi32>
    %4 = arith.cmpi eq, %1, %3 : vector<8x128xi32>
    %5 = arith.extui %4 : vector<8x128xi1> to vector<8x128xi32>
    %6 = arith.sitofp %5 : vector<8x128xi32> to vector<8x128xf32>
    %7 = arith.truncf %6 : vector<8x128xf32> to vector<8x128xbf16>
    %8 = vector.extract_strided_slice %0 {offsets = [0, 1], sizes = [8, 1], strides = [1, 1]} : vector<8x9xi32> to vector<8x1xi32>
    %9 = vector.broadcast %8 : vector<8x1xi32> to vector<8x128xi32>
    %10 = arith.cmpi eq, %1, %9 : vector<8x128xi32>
    %11 = arith.extui %10 : vector<8x128xi1> to vector<8x128xi32>
    %12 = arith.sitofp %11 : vector<8x128xi32> to vector<8x128xf32>
    %13 = arith.truncf %12 : vector<8x128xf32> to vector<8x128xbf16>
    %14 = vector.extract_strided_slice %0 {offsets = [0, 2], sizes = [8, 1], strides = [1, 1]} : vector<8x9xi32> to vector<8x1xi32>
    %15 = vector.broadcast %14 : vector<8x1xi32> to vector<8x128xi32>
    %16 = arith.cmpi eq, %1, %15 : vector<8x128xi32>
    %17 = arith.extui %16 : vector<8x128xi1> to vector<8x128xi32>
    %18 = arith.sitofp %17 : vector<8x128xi32> to vector<8x128xf32>
    %19 = arith.truncf %18 : vector<8x128xf32> to vector<8x128xbf16>
    %20 = vector.extract_strided_slice %0 {offsets = [0, 3], sizes = [8, 1], strides = [1, 1]} : vector<8x9xi32> to vector<8x1xi32>
    %21 = vector.broadcast %20 : vector<8x1xi32> to vector<8x128xi32>
    %22 = arith.cmpi eq, %1, %21 : vector<8x128xi32>
    %23 = arith.extui %22 : vector<8x128xi1> to vector<8x128xi32>
    %24 = arith.sitofp %23 : vector<8x128xi32> to vector<8x128xf32>
    %25 = arith.truncf %24 : vector<8x128xf32> to vector<8x128xbf16>
    %26 = vector.extract_strided_slice %0 {offsets = [0, 4], sizes = [8, 1], strides = [1, 1]} : vector<8x9xi32> to vector<8x1xi32>
    %27 = vector.broadcast %26 : vector<8x1xi32> to vector<8x128xi32>
    %28 = arith.cmpi eq, %1, %27 : vector<8x128xi32>
    %29 = arith.extui %28 : vector<8x128xi1> to vector<8x128xi32>
    %30 = arith.sitofp %29 : vector<8x128xi32> to vector<8x128xf32>
    %31 = arith.truncf %30 : vector<8x128xf32> to vector<8x128xbf16>
    %32 = vector.extract_strided_slice %0 {offsets = [0, 5], sizes = [8, 1], strides = [1, 1]} : vector<8x9xi32> to vector<8x1xi32>
    %33 = vector.broadcast %32 : vector<8x1xi32> to vector<8x128xi32>
    %34 = arith.cmpi eq, %1, %33 : vector<8x128xi32>
    %35 = arith.extui %34 : vector<8x128xi1> to vector<8x128xi32>
    %36 = arith.sitofp %35 : vector<8x128xi32> to vector<8x128xf32>
    %37 = arith.truncf %36 : vector<8x128xf32> to vector<8x128xbf16>
    %38 = vector.extract_strided_slice %0 {offsets = [0, 6], sizes = [8, 1], strides = [1, 1]} : vector<8x9xi32> to vector<8x1xi32>
    %39 = vector.broadcast %38 : vector<8x1xi32> to vector<8x128xi32>
    %40 = arith.cmpi eq, %1, %39 : vector<8x128xi32>
    %41 = arith.extui %40 : vector<8x128xi1> to vector<8x128xi32>
    %42 = arith.sitofp %41 : vector<8x128xi32> to vector<8x128xf32>
    %43 = arith.truncf %42 : vector<8x128xf32> to vector<8x128xbf16>
    %44 = vector.extract_strided_slice %0 {offsets = [0, 7], sizes = [8, 1], strides = [1, 1]} : vector<8x9xi32> to vector<8x1xi32>
    %45 = vector.broadcast %44 : vector<8x1xi32> to vector<8x128xi32>
    %46 = arith.cmpi eq, %1, %45 : vector<8x128xi32>
    %47 = arith.extui %46 : vector<8x128xi1> to vector<8x128xi32>
    %48 = arith.sitofp %47 : vector<8x128xi32> to vector<8x128xf32>
    %49 = arith.truncf %48 : vector<8x128xf32> to vector<8x128xbf16>
    %50 = vector.extract_strided_slice %0 {offsets = [0, 8], sizes = [8, 1], strides = [1, 1]} : vector<8x9xi32> to vector<8x1xi32>
    %51 = vector.broadcast %50 : vector<8x1xi32> to vector<8x128xi32>
    %52 = arith.cmpi eq, %1, %51 : vector<8x128xi32>
    %53 = arith.extui %52 : vector<8x128xi1> to vector<8x128xi32>
    %54 = arith.sitofp %53 : vector<8x128xi32> to vector<8x128xf32>
    %55 = arith.truncf %54 : vector<8x128xf32> to vector<8x128xbf16>
    %56 = tpu.concatenate %7, %13, %19, %25, %31, %37, %43, %49, %55 in 1 : vector<8x128xbf16>, vector<8x128xbf16>, vector<8x128xbf16>, vector<8x128xbf16>, vector<8x128xbf16>, vector<8x128xbf16>, vector<8x128xbf16>, vector<8x128xbf16>, vector<8x128xbf16> -> vector<8x1152xbf16>
    %c0_1 = arith.constant 0 : index
    %c0_2 = arith.constant 0 : index
    %57 = vector.load %arg2[%c0_1, %c0_2] : memref<1152x128xbf16, #tpu.memory_space<vmem>>, vector<1152x128xbf16>
    %cst = arith.constant dense<0.000000e+00> : vector<8x128xf32>
    %58 = tpu.matmul %56, %57, %cst {dimension_numbers = #tpu.dot_dimension_numbers<[1], [0], [0], [1], [0, 0, 1, 1], [], []>} : vector<8x1152xbf16>, vector<1152x128xbf16>, vector<8x128xf32> -> vector<8x128xf32>
    %59 = math.tanh %58 : vector<8x128xf32>
    %c0_3 = arith.constant 0 : index
    %c0_4 = arith.constant 0 : index
    %c0_5 = arith.constant 0 : index
    %60 = vector.load %arg3[%c0_3, %c0_4, %c0_5] : memref<4x128x128xf32, #tpu.memory_space<vmem>>, vector<1x128x128xf32>
    %61 = vector.shape_cast %60 : vector<1x128x128xf32> to vector<128x128xf32>
    %cst_6 = arith.constant dense<0.000000e+00> : vector<8x128xf32>
    %62 = tpu.matmul %59, %61, %cst_6 {dimension_numbers = #tpu.dot_dimension_numbers<[1], [0], [0], [1], [0, 0, 1, 1], [], []>} : vector<8x128xf32>, vector<128x128xf32>, vector<8x128xf32> -> vector<8x128xf32>
    %c0_7 = arith.constant 0 : index
    %c0_8 = arith.constant 0 : index
    %c0_9 = arith.constant 0 : index
    %63 = vector.load %arg4[%c0_7, %c0_8, %c0_9] : memref<4x1x128xf32, #tpu.memory_space<vmem>>, vector<1x1x128xf32>
    %64 = vector.shape_cast %63 : vector<1x1x128xf32> to vector<1x128xf32>
    %65 = vector.broadcast %64 : vector<1x128xf32> to vector<8x128xf32>
    %66 = arith.addf %62, %65 : vector<8x128xf32>
    %67 = math.tanh %66 : vector<8x128xf32>
    %c1 = arith.constant 1 : index
    %c0_10 = arith.constant 0 : index
    %c0_11 = arith.constant 0 : index
    %68 = vector.load %arg3[%c1, %c0_10, %c0_11] : memref<4x128x128xf32, #tpu.memory_space<vmem>>, vector<1x128x128xf32>
    %69 = vector.shape_cast %68 : vector<1x128x128xf32> to vector<128x128xf32>
    %cst_12 = arith.constant dense<0.000000e+00> : vector<8x128xf32>
    %70 = tpu.matmul %67, %69, %cst_12 {dimension_numbers = #tpu.dot_dimension_numbers<[1], [0], [0], [1], [0, 0, 1, 1], [], []>} : vector<8x128xf32>, vector<128x128xf32>, vector<8x128xf32> -> vector<8x128xf32>
    %c1_13 = arith.constant 1 : index
    %c0_14 = arith.constant 0 : index
    %c0_15 = arith.constant 0 : index
    %71 = vector.load %arg4[%c1_13, %c0_14, %c0_15] : memref<4x1x128xf32, #tpu.memory_space<vmem>>, vector<1x1x128xf32>
    %72 = vector.shape_cast %71 : vector<1x1x128xf32> to vector<1x128xf32>
    %73 = vector.broadcast %72 : vector<1x128xf32> to vector<8x128xf32>
    %74 = arith.addf %70, %73 : vector<8x128xf32>
    %75 = math.tanh %74 : vector<8x128xf32>
    %c2 = arith.constant 2 : index
    %c0_16 = arith.constant 0 : index
    %c0_17 = arith.constant 0 : index
    %76 = vector.load %arg3[%c2, %c0_16, %c0_17] : memref<4x128x128xf32, #tpu.memory_space<vmem>>, vector<1x128x128xf32>
    %77 = vector.shape_cast %76 : vector<1x128x128xf32> to vector<128x128xf32>
    %cst_18 = arith.constant dense<0.000000e+00> : vector<8x128xf32>
    %78 = tpu.matmul %75, %77, %cst_18 {dimension_numbers = #tpu.dot_dimension_numbers<[1], [0], [0], [1], [0, 0, 1, 1], [], []>} : vector<8x128xf32>, vector<128x128xf32>, vector<8x128xf32> -> vector<8x128xf32>
    %c2_19 = arith.constant 2 : index
    %c0_20 = arith.constant 0 : index
    %c0_21 = arith.constant 0 : index
    %79 = vector.load %arg4[%c2_19, %c0_20, %c0_21] : memref<4x1x128xf32, #tpu.memory_space<vmem>>, vector<1x1x128xf32>
    %80 = vector.shape_cast %79 : vector<1x1x128xf32> to vector<1x128xf32>
    %81 = vector.broadcast %80 : vector<1x128xf32> to vector<8x128xf32>
    %82 = arith.addf %78, %81 : vector<8x128xf32>
    %83 = math.tanh %82 : vector<8x128xf32>
    %c3 = arith.constant 3 : index
    %c0_22 = arith.constant 0 : index
    %c0_23 = arith.constant 0 : index
    %84 = vector.load %arg3[%c3, %c0_22, %c0_23] : memref<4x128x128xf32, #tpu.memory_space<vmem>>, vector<1x128x128xf32>
    %85 = vector.shape_cast %84 : vector<1x128x128xf32> to vector<128x128xf32>
    %cst_24 = arith.constant dense<0.000000e+00> : vector<8x128xf32>
    %86 = tpu.matmul %83, %85, %cst_24 {dimension_numbers = #tpu.dot_dimension_numbers<[1], [0], [0], [1], [0, 0, 1, 1], [], []>} : vector<8x128xf32>, vector<128x128xf32>, vector<8x128xf32> -> vector<8x128xf32>
    %c3_25 = arith.constant 3 : index
    %c0_26 = arith.constant 0 : index
    %c0_27 = arith.constant 0 : index
    %87 = vector.load %arg4[%c3_25, %c0_26, %c0_27] : memref<4x1x128xf32, #tpu.memory_space<vmem>>, vector<1x1x128xf32>
    %88 = vector.shape_cast %87 : vector<1x1x128xf32> to vector<1x128xf32>
    %89 = vector.broadcast %88 : vector<1x128xf32> to vector<8x128xf32>
    %90 = arith.addf %86, %89 : vector<8x128xf32>
    %91 = math.tanh %90 : vector<8x128xf32>
    %c0_28 = arith.constant 0 : index
    %c0_29 = arith.constant 0 : index
    %92 = vector.load %arg5[%c0_28, %c0_29] : memref<128x128xf32, #tpu.memory_space<vmem>>, vector<128x128xf32>
    %cst_30 = arith.constant dense<0.000000e+00> : vector<8x128xf32>
    %93 = tpu.matmul %91, %92, %cst_30 {dimension_numbers = #tpu.dot_dimension_numbers<[1], [0], [0], [1], [0, 0, 1, 1], [], []>} : vector<8x128xf32>, vector<128x128xf32>, vector<8x128xf32> -> vector<8x128xf32>
    %c0_31 = arith.constant 0 : index
    %c0_32 = arith.constant 0 : index
    %94 = vector.load %arg6[%c0_31, %c0_32] : memref<1x128xf32, #tpu.memory_space<vmem>>, vector<1x128xf32>
    %95 = vector.broadcast %94 : vector<1x128xf32> to vector<8x128xf32>
    %96 = arith.addf %93, %95 : vector<8x128xf32>
    %97 = vector.extract_strided_slice %96 {offsets = [0, 0], sizes = [8, 12], strides = [1, 1]} : vector<8x128xf32> to vector<8x12xf32>
    %c0_33 = arith.constant 0 : index
    %c0_34 = arith.constant 0 : index
    %98 = vector.load %arg7[%c0_33, %c0_34] : memref<8x12xf32, #tpu.memory_space<vmem>>, vector<8x12xf32>
    tpu.vector_store %arg7[%c0_33, %c0_34], %97 {strides = array<i32>} : memref<8x12xf32, #tpu.memory_space<vmem>>, vector<8x12xf32>,
    return
  }
  func.func @transform_0(%arg0: i32) -> (i32, i32) {
    %c0_i32 = arith.constant 0 : i32
    %c0_i32_0 = arith.constant 0 : i32
    return %arg0, %c0_i32 : i32, i32
  }
  func.func @transform_1(%arg0: i32) -> (i32, i32) {
    %c0_i32 = arith.constant 0 : i32
    %c0_i32_0 = arith.constant 0 : i32
    %c0_i32_1 = arith.constant 0 : i32
    return %c0_i32, %c0_i32_0 : i32, i32
  }
  func.func @transform_2(%arg0: i32) -> (i32, i32, i32) {
    %c0_i32 = arith.constant 0 : i32
    %c0_i32_0 = arith.constant 0 : i32
    %c0_i32_1 = arith.constant 0 : i32
    %c0_i32_2 = arith.constant 0 : i32
    return %c0_i32, %c0_i32_0, %c0_i32_1 : i32, i32, i32
  }
  func.func @transform_3(%arg0: i32) -> (i32, i32, i32) {
    %c0_i32 = arith.constant 0 : i32
    %c0_i32_0 = arith.constant 0 : i32
    %c0_i32_1 = arith.constant 0 : i32
    %c0_i32_2 = arith.constant 0 : i32
    return %c0_i32, %c0_i32_0, %c0_i32_1 : i32, i32, i32
  }
  func.func @transform_4(%arg0: i32) -> (i32, i32) {
    %c0_i32 = arith.constant 0 : i32
    %c0_i32_0 = arith.constant 0 : i32
    %c0_i32_1 = arith.constant 0 : i32
    return %c0_i32, %c0_i32_0 : i32, i32
  }
  func.func @transform_5(%arg0: i32) -> (i32, i32) {
    %c0_i32 = arith.constant 0 : i32
    %c0_i32_0 = arith.constant 0 : i32
    %c0_i32_1 = arith.constant 0 : i32
    return %c0_i32, %c0_i32_0 : i32, i32
  }
  func.func @transform_6(%arg0: i32) -> (i32, i32) {
    %c0_i32 = arith.constant 0 : i32
    %c0_i32_0 = arith.constant 0 : i32
    return %arg0, %c0_i32 : i32, i32
  }
}

</mosaic_0001>

<bundles_post_ra>
// kernel: tpu_custom_call.1
= control target key start
LH: loop header
LB: loop body
LE: loop exit
PB: predicated region body
PF: predicated region fallthrough
CT: control target
= control target key end

     0   :  { %11 = vsyncpa [#allocation3], 0  ;;  %s2325_s0 = inlined_call_operand.hbm [shape: s32[8,9], index: 0, kind: input, shape index: {}]   ;;  %s2326_s1 = inlined_call_operand.hbm [shape: bf16[1152,128], index: 1, kind: input, shape index: {}]   ;;  %s2327_s2 = inlined_call_operand.hbm [shape: f32[4,128,128], index: 2, kind: input, shape index: {}]   ;;  %s2328_s3 = inlined_call_operand.vmem [shape: f32[4,1,128], index: 3, kind: input, shape index: {}]   ;;  %s2329_s4 = inlined_call_operand.hbm [shape: f32[128,128], index: 4, kind: input, shape index: {}]   ;;  %s2330_s5 = inlined_call_operand.vmem [shape: f32[1,128], index: 5, kind: input, shape index: {}]   ;;  %s2331_s6 = inlined_call_operand.hbm [shape: f32[8,12], index: 6, kind: output, shape index: {}]  }
   0x1   :  { %12 = vsyncpa [#allocation6], 0 }
   0x2   :  { %13 = vsyncpa [#allocation9], 0 }
   0x3   :  { %14 = vsyncpa [#allocation4], 0  ;;  %s2119_s21 = smov [#allocation5]  }
   0x4   :  { %s30_s22 = sshll.u32 %s2119_s21, 4  ;;  %s31_s22 = int_to_ptr.vmem [resolvable:$true] %s30_s22 }
   0x5   :  { %s2019_s23 = scalar_lea.vmem %s31_s22, 9216  ;;  %p2024_p1 = scmp.lt.s32.totalorder %s31_s22, %s31_s22 }
   0x6   :  { %p2020_p0 = scmp.ne.s32.totalorder %s31_s22, %s2019_s23  ;;  %p2025_p2 = scmp.lt.s32.totalorder %s2019_s23, %s2019_s23 }
   0x8   :  { %p2026_p3 = por %p2025_p2, %p2024_p1 }
   0xa   :  { %p2027_p4 = pnand %p2026_p3, %p2020_p0 }
   0xc   :  { %2030 = shalt.err (!%p2027_p4)
}
   0xd   :  { %s2120_s24 = smov 64   ;;  %s2121_s25 = smov 4  }
   0xe   :  { %36 = dma.hbm_to_vmem [thread:$0]  %s2326_s1, 9216, %s31_s22, [#allocation6], %s2120_s24, %s2120_s24, %s2121_s25  }
   0xf   :  { %s2122_s28 = smov [#allocation2]   ;;  %s2123_s30 = smov [#allocation7]  }
  0x10   :  { %s21_s29 = sshll.u32 %s2122_s28, 4  ;;  %s42_s7 = sshll.u32 %s2123_s30, 4  ;;  %s22_s29 = int_to_ptr.vmem [resolvable:$true] %s21_s29  ;;  %s43_s7 = int_to_ptr.vmem [resolvable:$true] %s42_s7 }
  0x11   :  { %s2039_s8 = scalar_lea.vmem %s22_s29, 128  ;;  %p2044_p6 = scmp.lt.s32.totalorder %s22_s29, %s22_s29 }
  0x12   :  { %p2040_p5 = scmp.ne.s32.totalorder %s22_s29, %s2039_s8  ;;  %p2045_p7 = scmp.lt.s32.totalorder %s2039_s8, %s2039_s8 }
  0x14   :  { %p2046_p8 = por %p2045_p7, %p2044_p6 }
  0x16   :  { %p2047_p9 = pnand %p2046_p8, %p2040_p5 }
  0x18   :  { %2050 = shalt.err (!%p2047_p9)
}
  0x19   :  { %24 = dma.hbm_to_vmem [thread:$0]  %s2325_s0, 128, %s22_s29, [#allocation3]  }
  0x1a   :  { %s2059_s11 = scalar_lea.vmem %s43_s7, 8192  ;;  %p2064_p11 = scmp.lt.s32.totalorder %s43_s7, %s43_s7 }
  0x1b   :  { %p2060_p10 = scmp.ne.s32.totalorder %s43_s7, %s2059_s11  ;;  %p2065_p12 = scmp.lt.s32.totalorder %s2059_s11, %s2059_s11 }
  0x1d   :  { %p2066_p13 = por %p2065_p12, %p2064_p11 }
  0x1f   :  { %p2067_p0 = pnand %p2066_p13, %p2060_p10 }
  0x21   :  { %2070 = shalt.err (!%p2067_p0)
}
  0x22   :  { %s2124_s1 = smov 128   ;;  %s2125_s12 = smov 8  }
  0x23   :  { %48 = dma.hbm_to_vmem [thread:$0]  %s2327_s2, 8192, %s43_s7, [#allocation6], %s2124_s1, %s2124_s1, %s2125_s12  }
  0x24   :  { %s2126_s15 = smov [#allocation8]  }
  0x25   :  { %s56_s16 = sshll.u32 %s2126_s15, 4  ;;  %s57_s16 = int_to_ptr.vmem [resolvable:$true] %s56_s16 }
  0x26   :  { %s2079_s17 = scalar_lea.vmem %s57_s16, 2048  ;;  %p2084_p2 = scmp.lt.s32.totalorder %s57_s16, %s57_s16 }
  0x27   :  { %p2080_p1 = scmp.ne.s32.totalorder %s57_s16, %s2079_s17  ;;  %p2085_p3 = scmp.lt.s32.totalorder %s2079_s17, %s2079_s17 }
  0x29   :  { %p2086_p4 = por %p2085_p3, %p2084_p2 }
  0x2b   :  { %p2087_p5 = pnand %p2086_p4, %p2080_p1 }
  0x2d   :  { %2090 = shalt.err (!%p2087_p5)
}
  0x2e   :  { %62 = dma.hbm_to_vmem [thread:$0]  %s2329_s4, 2048, %s57_s16, [#allocation9], %s2124_s1, %s2124_s1, %s2125_s12  }
  0x2f   :  { %2111 = dma.done.wait [#allocation3], 128  }
  0x30   :  { %2112 = vsyncadd [#allocation3], 4294967168 }
  0x31   :  { %2113 = dma.done.wait [#allocation6], 17408  }
  0x32   :  { %2114 = vsyncadd [#allocation6], 4294949888 }
  0x33   :  { %2115 = dma.done.wait [#allocation9], 2048  }
  0x34   :  { %2116 = vsyncadd [#allocation9], 4294965248  ;;  %v2127_v0 = vmov 3   ;;  %v2128_v1 = vmov 1   ;;  %v78_v2 = vld [vmem:[#allocation2] sm:$0xff]  ;;  %v2129_v7 = vmov 2   ;;  %v79_v44 = vlaneseq }
  0x35   :  { %1922 = vset.pattern.permute.xlu1 %v2127_v0  ;;  %1920 = vset.pattern.permute.xlu0 %v2128_v1  ;;  %v1929_v3 = vld [vmem:[#allocation5 + $0x78] sm:$0xff]   ;;  %v2130_v8 = vmov 0   ;;  %v1933_v9 = vld [vmem:[#allocation5 + $0x70] sm:$0xff]   ;;  %v1937_v13 = vld [vmem:[#allocation5 + $0x68] sm:$0xff]   ;;  %v2131_v14 = vmov 5   ;;  %v2132_v15 = vmov 4  }
  0x36   :  { %103 = vperm.xlu1 %1922, %v78_v2   ;;  %89 = vperm.xlu0 %1920, %v78_v2   ;;  %v1930_v4 = vld [vmem:[#allocation5 + $0x38] sm:$0xff]   ;;  %v1934_v10 = vld [vmem:[#allocation5 + $0x30] sm:$0xff]   ;;  %v1938_v16 = vld [vmem:[#allocation5 + $0x28] sm:$0xff]   ;;  %v2133_v21 = vmov 7   ;;  %v2134_v22 = vmov 8   ;;  %v2135_v28 = vmov 6  }
  0x37   :  { %1522 = vmatprep.subr.bf16.mxu0 %v1929_v3  ;;  %v1931_v5 = vld [vmem:[#allocation5 + $0xf8] sm:$0xff]   ;;  %v1935_v11 = vld [vmem:[#allocation5 + $0xf0] sm:$0xff]   ;;  %v1939_v17 = vld [vmem:[#allocation5 + $0xe8] sm:$0xff]   ;;  %v2187_v45 = vand.u32 127, %v79_v44  ;;  %v2136_v48 = vmov 1.0|1.0  }
  0x38   :  { %1523 = vmatpush3.bf16.msra.mxu0 %v1930_v4  ;;  %v1932_v6 = vld [vmem:[#allocation5 + $0xb8] sm:$0xff]   ;;  %1544 = vmatprep.subr.bf16.mxu1 %v1931_v5  ;;  %v1936_v12 = vld [vmem:[#allocation5 + $0xb0] sm:$0xff]   ;;  %v1940_v18 = vld [vmem:[#allocation5 + $0xa8] sm:$0xff]   ;;  %s2139_s27 = smov [#allocation10]  }
  0x39   :  { %1524 = vmatprep.subr.bf16.mxu0 %v1933_v9  ;;  %1545 = vmatpush3.bf16.msra.mxu1 %v1932_v6  ;;  %v1941_v19 = vld [vmem:[#allocation5 + $0x60] sm:$0xff]   ;;  %v1945_v25 = vld [vmem:[#allocation5 + $0x58] sm:$0xff]   ;;  %v1949_v30 = vld [vmem:[#allocation5 + $0x50] sm:$0xff]   ;;  %s1404_s28 = sshll.u32 %s2139_s27, 4  ;;  %s1405_s28 = int_to_ptr.vmem [resolvable:$true] %s1404_s28 }
  0x3a   :  { %1923 = vset.pattern.permute.xlu1 %v2129_v7  ;;  %1921 = vset.pattern.permute.xlu0 %v2130_v8  ;;  %v1942_v20 = vld [vmem:[#allocation5 + $0x20] sm:$0xff]   ;;  %v1946_v26 = vld [vmem:[#allocation5 + $0x18] sm:$0xff]   ;;  %v1950_v31 = vld [vmem:[#allocation5 + $0x10] sm:$0xff]   ;;  %s2091_s29 = scalar_lea.vmem %s1405_s28, 128  ;;  %p2096_p7 = scmp.lt.s32.totalorder %s1405_s28, %s1405_s28 }
  0x3b   :  { %96 = vperm.xlu1 %1923, %v78_v2   ;;  %82 = vperm.xlu0 %1921, %v78_v2   ;;  %v1943_v23 = vld [vmem:[#allocation5 + $0xe0] sm:$0xff]   ;;  %v1947_v27 = vld [vmem:[#allocation5 + $0xd8] sm:$0xff]   ;;  %v1951_v32 = vld [vmem:[#allocation5 + $0xd0] sm:$0xff]   ;;  %p2092_p6 = scmp.ne.s32.totalorder %s1405_s28, %s2091_s29  ;;  %p2097_p8 = scmp.lt.s32.totalorder %s2091_s29, %s2091_s29 }
  0x3c   :  { %1525 = vmatpush3.bf16.msra.mxu0 %v1934_v10  ;;  %1546 = vmatprep.subr.bf16.mxu1 %v1935_v11  ;;  %v1944_v24 = vld [vmem:[#allocation5 + $0xa0] sm:$0xff]   ;;  %v1948_v29 = vld [vmem:[#allocation5 + $0x98] sm:$0xff]   ;;  %v1952_v33 = vld [vmem:[#allocation5 + $0x90] sm:$0xff]  }
  0x3d   :  { %1547 = vmatpush3.bf16.msra.mxu1 %v1936_v12  ;;  %1526 = vmatprep.subr.bf16.mxu0 %v1937_v13  ;;  %v1953_v34 = vld [vmem:[#allocation5 + $0x48] sm:$0xff]   ;;  %v1957_v38 = vld [vmem:[#allocation5 + $0x40] sm:$0xff]   ;;  %v1961_v42 = vld [vmem:[#allocation5 + $0x178] sm:$0xff]   ;;  %p2098_p9 = por %p2097_p8, %p2096_p7 }
  0x3e   :  { %1548 = vmatprep.subr.bf16.mxu1 %v1939_v17  ;;  %v1954_v35 = vld [vmem:[#allocation5 + $0x8] sm:$0xff]   ;;  %v1958_v39 = vld [vmem:[#allocation5] sm:$0xff]   ;;  %v1963_v43 = vld [vmem:[#allocation5 + $0x1f8] sm:$0xff]  }
  0x3f   :  { %1924 = vset.pattern.permute.xlu1 %v2131_v14  ;;  %1925 = vset.pattern.permute.xlu0 %v2132_v15  ;;  %v1955_v36 = vld [vmem:[#allocation5 + $0xc8] sm:$0xff]   ;;  %v1959_v40 = vld [vmem:[#allocation5 + $0xc0] sm:$0xff]   ;;  %v1964_v51 = vld [vmem:[#allocation5 + $0x1b8] sm:$0xff]   ;;  %p2099_p10 = pnand %p2098_p9, %p2092_p6 }
  0x40   :  { %117 = vperm.xlu1 %1924, %v78_v2   ;;  %110 = vperm.xlu0 %1925, %v78_v2   ;;  %v1956_v37 = vld [vmem:[#allocation5 + $0x88] sm:$0xff]   ;;  %v1960_v41 = vld [vmem:[#allocation5 + $0x80] sm:$0xff]   ;;  %v1962_v52 = vld [vmem:[#allocation5 + $0x138] sm:$0xff]  }
  0x41   :  { %1527 = vmatpush3.bf16.msra.mxu0 %v1938_v16  ;;  %1549 = vmatpush3.bf16.msra.mxu1 %v1940_v18  ;;  %v1967_v53 = vld [vmem:[#allocation5 + $0x1f0] sm:$0xff]   ;;  %v1971_v57 = vld [vmem:[#allocation5 + $0x1e8] sm:$0xff]   ;;  %v1975_v62 = vld [vmem:[#allocation5 + $0x1e0] sm:$0xff]  }
  0x42   :  { %1528 = vmatprep.subr.bf16.mxu0 %v1941_v19  ;;  %1550 = vmatprep.subr.bf16.mxu1 %v1943_v23  ;;  %v1965_v54 = vld [vmem:[#allocation5 + $0x170] sm:$0xff]   ;;  %v1969_v59 = vld [vmem:[#allocation5 + $0x168] sm:$0xff]   ;;  %v1973_v63 = vld [vmem:[#allocation5 + $0x160] sm:$0xff]  }
  0x43   :  { %v1968_v55 = vld [vmem:[#allocation5 + $0x1b0] sm:$0xff]   ;;  %v1972_v60 = vld [vmem:[#allocation5 + $0x1a8] sm:$0xff]   ;;  %v1976_v1 = vld [vmem:[#allocation5 + $0x1a0] sm:$0xff]  }
  0x44   :  { %1926 = vset.pattern.permute.xlu1 %v2133_v21  ;;  %1928 = vset.pattern.permute.xlu0 %v2134_v22  ;;  %v1966_v56 = vld [vmem:[#allocation5 + $0x130] sm:$0xff]   ;;  %v1970_v61 = vld [vmem:[#allocation5 + $0x128] sm:$0xff]   ;;  %v1979_v3 = vld [vmem:[#allocation5 + $0x1d8] sm:$0xff]   ;;  %v2137_v22 = vmov 0.0  }
  0x45   :  { %131 = vperm.xlu1 %1926, %v78_v2   ;;  %138 = vperm.xlu0 %1928, %v78_v2   ;;  %v1977_v4 = vld [vmem:[#allocation5 + $0x158] sm:$0xff]   ;;  %v1983_v7 = vld [vmem:[#allocation5 + $0x1d0] sm:$0xff]   ;;  %v1987_v11 = vld [vmem:[#allocation5 + $0x1c8] sm:$0xff]  }
  0x46   :  { %1529 = vmatpush3.bf16.msra.mxu0 %v1942_v20  ;;  %1551 = vmatpush3.bf16.msra.mxu1 %v1944_v24  ;;  %v1980_v5 = vld [vmem:[#allocation5 + $0x198] sm:$0xff]   ;;  %v1981_v8 = vld [vmem:[#allocation5 + $0x150] sm:$0xff]   ;;  %v1985_v12 = vld [vmem:[#allocation5 + $0x148] sm:$0xff]  }
  0x47   :  { %1530 = vmatprep.subr.bf16.mxu0 %v1945_v25  ;;  %1552 = vmatprep.subr.bf16.mxu1 %v1947_v27  ;;  %v1978_v6 = vld [vmem:[#allocation5 + $0x118] sm:$0xff]   ;;  %v1984_v9 = vld [vmem:[#allocation5 + $0x190] sm:$0xff]   ;;  %v1988_v13 = vld [vmem:[#allocation5 + $0x188] sm:$0xff]  }
  0x48   :  { %v1982_v10 = vld [vmem:[#allocation5 + $0x110] sm:$0xff]   ;;  %v1986_v14 = vld [vmem:[#allocation5 + $0x108] sm:$0xff]   ;;  %v1991_v15 = vld [vmem:[#allocation5 + $0x1c0] sm:$0xff]  }
  0x49   :  { %1927 = vset.pattern.permute.xlu1 %v2135_v28  ;;  %v1989_v16 = vld [vmem:[#allocation5 + $0x140] sm:$0xff]   ;;  %v1993_v21 = vld [vmem:[#allocation5 + $0x238] sm:$0xff]   ;;  %v1994_v23 = vld [vmem:[#allocation5 + $0x230] sm:$0xff]  }
  0x4a   :  { %124 = vperm.xlu1 %1927, %v78_v2   ;;  %1531 = vmatpush3.bf16.msra.mxu0 %v1946_v26  ;;  %v1974_v2 = vld [vmem:[#allocation5 + $0x120] sm:$0xff]   ;;  %v1995_v24 = vld [vmem:[#allocation5 + $0x228] sm:$0xff]   ;;  %v1997_v26 = vld [vmem:[#allocation5 + $0x218] sm:$0xff]  }
  0x4b   :  { %1532 = vmatprep.subr.bf16.mxu0 %v1949_v30  ;;  %1553 = vmatpush3.bf16.msra.mxu1 %v1948_v29  ;;  %v1992_v19 = vld [vmem:[#allocation5 + $0x180] sm:$0xff]   ;;  %v1998_v27 = vld [vmem:[#allocation5 + $0x210] sm:$0xff]   ;;  %v1999_v28 = vld [vmem:[#allocation5 + $0x208] sm:$0xff]  }
  0x4c   :  { %1554 = vmatprep.subr.bf16.mxu1 %v1951_v32  ;;  %v1990_v20 = vld [vmem:[#allocation5 + $0x100] sm:$0xff]   ;;  %v935_v32 = vld [vmem:[#allocation7 + $0x70] sm:$0xff] }
  0x4d   :  { %v1996_v25 = vld [vmem:[#allocation5 + $0x220] sm:$0xff]   ;;  %v923_v44 = vld [vmem:[#allocation7 + $0x10] sm:$0xff] }
  0x4e   :  { %1533 = vmatpush3.bf16.msra.mxu0 %v1950_v31  ;;  %v2000_v30 = vld [vmem:[#allocation5 + $0x200] sm:$0xff]   ;;  %v936_v31 = vld [vmem:[#allocation7 + $0x78] sm:$0xff] }
  0x4f   :  { %1534 = vmatprep.subr.bf16.mxu0 %v1953_v34  ;;  %1555 = vmatpush3.bf16.msra.mxu1 %v1952_v33  ;;  %v934_v33 = vld [vmem:[#allocation7 + $0x68] sm:$0xff]  ;;  %v933_v34 = vld [vmem:[#allocation7 + $0x60] sm:$0xff] }
  0x50   :  { %1556 = vmatprep.subr.bf16.mxu1 %v1955_v36  ;;  %v931_v36 = vld [vmem:[#allocation7 + $0x50] sm:$0xff] }
  0x52   :  { %1535 = vmatpush3.bf16.msra.mxu0 %v1954_v35  ;;  %v932_v35 = vld [vmem:[#allocation7 + $0x58] sm:$0xff] }
  0x53   :  { %1536 = vmatprep.subr.bf16.mxu0 %v1957_v38  ;;  %1557 = vmatpush3.bf16.msra.mxu1 %v1956_v37  ;;  %v930_v37 = vld [vmem:[#allocation7 + $0x48] sm:$0xff]  ;;  %v929_v38 = vld [vmem:[#allocation7 + $0x40] sm:$0xff] }
  0x54   :  { %1558 = vmatprep.subr.bf16.mxu1 %v1959_v40  ;;  %v927_v40 = vld [vmem:[#allocation7 + $0x30] sm:$0xff] }
  0x56   :  { %1537 = vmatpush3.bf16.msra.mxu0 %v1958_v39  ;;  %v928_v39 = vld [vmem:[#allocation7 + $0x38] sm:$0xff] }
  0x57   :  { %1566 = vmatprep.subr.bf16.mxu0 %v1961_v42  ;;  %1559 = vmatpush3.bf16.msra.mxu1 %v1960_v41  ;;  %v926_v41 = vld [vmem:[#allocation7 + $0x28] sm:$0xff]  ;;  %v925_v42 = vld [vmem:[#allocation7 + $0x20] sm:$0xff] }
  0x58   :  { %1588 = vmatprep.subr.bf16.mxu1 %v1963_v43  ;;  %v924_v43 = vld [vmem:[#allocation7 + $0x18] sm:$0xff] }
  0xb1   :  { %v90_v46 = vpop.permute.xlu0 %89  ;;  %v104_v47 = vpop.permute.xlu1 %103 }
  0xb2   :  { %vm91_vm0 = vcmp.eq.s32.totalorder %v2187_v45, %v90_v46  ;;  %vm105_vm1 = vcmp.eq.s32.totalorder %v2187_v45, %v104_v47  ;;  %v921_v46 = vld [vmem:[#allocation7] sm:$0xff]  ;;  %v1031_v47 = vld [vmem:[#allocation7 + $0xf8] sm:$0xff] }
  0xb3   :  { %vm1496_vm2 = vmpackc.low %vm91_vm0, %vm91_vm0  ;;  %vm2138_vm0 = vmmov 0  }
  0xb4   :  { %1497 = vmatprep.mubr.msk.bf16.mxu0 %vm1496_vm2, %v2136_v48  ;;  %vm1500_vm3 = vmpackc.low %vm105_vm1, %vm105_vm1 }
  0xb5   :  { %1501 = vmatprep.mubr.msk.bf16.mxu1 %vm1500_vm3, %v2136_v48  ;;  %vm1396_vm3 = vcmask 97280  }
  0xb6   :  { %v97_v49 = vpop.permute.xlu1 %96  ;;  %v83_v50 = vpop.permute.xlu0 %82 }
  0xb7   :  { %vm98_vm4 = vcmp.eq.s32.totalorder %v2187_v45, %v97_v49  ;;  %vm84_vm5 = vcmp.eq.s32.totalorder %v2187_v45, %v83_v50  ;;  %v1029_v49 = vld [vmem:[#allocation7 + $0xe8] sm:$0xff]  ;;  %v1028_v50 = vld [vmem:[#allocation7 + $0xe0] sm:$0xff] }
  0xb8   :  { %vm1502_vm6 = vmpackc.low %vm98_vm4, %vm98_vm4 }
  0xb9   :  { %vm1498_vm7 = vmpackc.low %vm84_vm5, %vm84_vm5  ;;  %1503 = vmatmul.mubr.msk.bf16.vlgmr.msra.gmra.mxu1 %vm1502_vm6, %v2136_v48 }
  0xba   :  { %1499 = vmatmul.mubr.msk.bf16.vlgmr.msra.gmra.mxu0 %vm1498_vm7, %v2136_v48  ;;  %1589 = vmatpush3.bf16.msra.mxu1 %v1964_v51  ;;  %v1027_v51 = vld [vmem:[#allocation7 + $0xd8] sm:$0xff] }
  0xbb   :  { %1567 = vmatpush3.bf16.msra.mxu0 %v1962_v52  ;;  %1590 = vmatprep.subr.bf16.mxu1 %v1967_v53  ;;  %v118_v58 = vpop.permute.xlu1 %117  ;;  %v111_v18 = vpop.permute.xlu0 %110  ;;  %v1026_v52 = vld [vmem:[#allocation7 + $0xd0] sm:$0xff]  ;;  %v1025_v53 = vld [vmem:[#allocation7 + $0xc8] sm:$0xff] }
  0xbc   :  { %1568 = vmatprep.subr.bf16.mxu0 %v1965_v54  ;;  %vm119_vm8 = vcmp.eq.s32.totalorder %v2187_v45, %v118_v58  ;;  %vm112_vm13 = vcmp.eq.s32.totalorder %v2187_v45, %v111_v18 }
  0xbd   :  { %vm1504_vm9 = vmpackc.low %vm119_vm8, %vm119_vm8 }
  0xbe   :  { %1591 = vmatpush3.bf16.msra.mxu1 %v1968_v55  ;;  %1505 = vmatprep.mubr.msk.bf16.mxu0 %vm1504_vm9, %v2136_v48  ;;  %vm1506_vm15 = vmpackc.low %vm112_vm13, %vm112_vm13 }
  0xbf   :  { %1569 = vmatpush3.bf16.msra.mxu0 %v1966_v56  ;;  %1592 = vmatprep.subr.bf16.mxu1 %v1971_v57 }
  0xc0   :  { %1570 = vmatprep.subr.bf16.mxu0 %v1969_v59  ;;  %v132_v0 = vpop.permute.xlu1 %131  ;;  %v139_v29 = vpop.permute.xlu0 %138 }
  0xc1   :  { %vm133_vm10 = vcmp.eq.s32.totalorder %v2187_v45, %v132_v0  ;;  %vm140_vm1 = vcmp.eq.s32.totalorder %v2187_v45, %v139_v29  ;;  %v1127_v29 = vld [vmem:[#allocation7 + $0x178] sm:$0xff] }
  0xc2   :  { %1593 = vmatpush3.bf16.msra.mxu1 %v1972_v60  ;;  %vm1508_vm11 = vmpackc.low %vm133_vm10, %vm133_vm10 }
  0xc3   :  { %1571 = vmatpush3.bf16.msra.mxu0 %v1970_v61  ;;  %1594 = vmatprep.subr.bf16.mxu1 %v1975_v62  ;;  %vm1512_vm2 = vmpackc.low %vm140_vm1, %vm140_vm1 }
  0xc4   :  { %1572 = vmatprep.subr.bf16.mxu0 %v1973_v63  ;;  %1509 = vmatprep.mubr.msk.bf16.mxu1 %vm1508_vm11, %v2136_v48 }
  0xc5   :  { %v125_v17 = vpop.permute.xlu1 %124 }
  0xc6   :  { %1595 = vmatpush3.bf16.msra.mxu1 %v1976_v1  ;;  %vm126_vm12 = vcmp.eq.s32.totalorder %v2187_v45, %v125_v17  ;;  %v922_v45 = vld [vmem:[#allocation7 + $0x8] sm:$0xff] }
  0xc7   :  { %1573 = vmatpush3.bf16.msra.mxu0 %v1974_v2  ;;  %1596 = vmatprep.subr.bf16.mxu1 %v1979_v3  ;;  %vm1510_vm14 = vmpackc.low %vm126_vm12, %vm126_vm12 }
  0xc8   :  { %1574 = vmatprep.subr.bf16.mxu0 %v1977_v4 }
  0xca   :  { %1597 = vmatpush3.bf16.msra.mxu1 %v1980_v5 }
  0xcb   :  { %1575 = vmatpush3.bf16.msra.mxu0 %v1978_v6  ;;  %1598 = vmatprep.subr.bf16.mxu1 %v1983_v7 }
  0xcc   :  { %1576 = vmatprep.subr.bf16.mxu0 %v1981_v8 }
  0xce   :  { %1599 = vmatpush3.bf16.msra.mxu1 %v1984_v9 }
  0xcf   :  { %1577 = vmatpush3.bf16.msra.mxu0 %v1982_v10  ;;  %1600 = vmatprep.subr.bf16.mxu1 %v1987_v11 }
  0xd0   :  { %1578 = vmatprep.subr.bf16.mxu0 %v1985_v12 }
  0xd2   :  { %1601 = vmatpush3.bf16.msra.mxu1 %v1988_v13 }
  0xd3   :  { %1579 = vmatpush3.bf16.msra.mxu0 %v1986_v14  ;;  %1602 = vmatprep.subr.bf16.mxu1 %v1991_v15 }
  0xd4   :  { %1580 = vmatprep.subr.bf16.mxu0 %v1989_v16 }
  0xd6   :  { %1603 = vmatpush3.bf16.msra.mxu1 %v1992_v19  ;;  %v1024_v19 = vld [vmem:[#allocation7 + $0xc0] sm:$0xff] }
  0xd7   :  { %1581 = vmatpush3.bf16.msra.mxu0 %v1990_v20  ;;  %1724 = vmatprep.subr.mxu1 %v2137_v22  ;;  %v1023_v20 = vld [vmem:[#allocation7 + $0xb8] sm:$0xff] }
  0xd8   :  { %1704 = vmatprep.subr.bf16.mxu0 %v2137_v22 }
  0xd9   :  { %1511 = vmatmul.mubr.msk.bf16.vlgmr.msra.gmra.mxu1 %vm1510_vm14, %v2136_v48 }
  0xda   :  { %1507 = vmatmul.mubr.msk.bf16.vlgmr.msra.gmra.mxu0 %vm1506_vm15, %v2136_v48  ;;  %1756 = vmatprep.mubr.msk.f32.mxu1 %vm2138_vm0, %v2137_v22 }
  0xdb   :  { %1705 = vmatpush3.bf16.msra.mxu0 %v1993_v21  ;;  %1720 = vmatprep.mubr.msk.bf16.mxu0 %vm2138_vm0, %v2137_v22  ;;  %v1022_v21 = vld [vmem:[#allocation7 + $0xb0] sm:$0xff] }
  0xdc   :  { %1706 = vmatprep.subr.bf16.mxu0 %v2137_v22  ;;  %1725 = vmatpush3.msra.mxu1 %v936_v31  ;;  %v1125_v31 = vld [vmem:[#allocation7 + $0x168] sm:$0xff] }
  0xdd   :  { %1726 = vmatprep.subr.mxu1 %v2137_v22 }
  0xde   :  { %1727 = vmatpush3.msra.mxu1 %v935_v32  ;;  %v1124_v32 = vld [vmem:[#allocation7 + $0x160] sm:$0xff] }
  0xdf   :  { %1707 = vmatpush3.bf16.msra.mxu0 %v1994_v23  ;;  %1728 = vmatprep.subr.mxu1 %v2137_v22  ;;  %v1021_v23 = vld [vmem:[#allocation7 + $0xa8] sm:$0xff] }
  0xe0   :  { %1708 = vmatprep.subr.bf16.mxu0 %v2137_v22  ;;  %1729 = vmatpush3.msra.mxu1 %v934_v33  ;;  %v1123_v33 = vld [vmem:[#allocation7 + $0x158] sm:$0xff] }
  0xe1   :  { %1730 = vmatprep.subr.mxu1 %v2137_v22 }
  0xe2   :  { %1731 = vmatpush3.msra.mxu1 %v933_v34  ;;  %v1122_v34 = vld [vmem:[#allocation7 + $0x150] sm:$0xff] }
  0xe3   :  { %1709 = vmatpush3.bf16.msra.mxu0 %v1995_v24  ;;  %1732 = vmatprep.subr.mxu1 %v2137_v22  ;;  %v1020_v24 = vld [vmem:[#allocation7 + $0xa0] sm:$0xff] }
  0xe4   :  { %1710 = vmatprep.subr.bf16.mxu0 %v2137_v22  ;;  %1733 = vmatpush3.msra.mxu1 %v932_v35  ;;  %v1121_v35 = vld [vmem:[#allocation7 + $0x148] sm:$0xff] }
  0xe5   :  { %1734 = vmatprep.subr.mxu1 %v2137_v22 }
  0xe6   :  { %1735 = vmatpush3.msra.mxu1 %v931_v36  ;;  %v1514_v36 = vld [vmem:[%s2328_s3] ss:$0 sm:$0xff] }
  0xe7   :  { %1711 = vmatpush3.bf16.msra.mxu0 %v1996_v25  ;;  %1736 = vmatprep.subr.mxu1 %v2137_v22  ;;  %v1019_v25 = vld [vmem:[#allocation7 + $0x98] sm:$0xff] }
  0xe8   :  { %1712 = vmatprep.subr.bf16.mxu0 %v2137_v22  ;;  %1737 = vmatpush3.msra.mxu1 %v930_v37 }
  0xe9   :  { %1738 = vmatprep.subr.mxu1 %v2137_v22 }
  0xea   :  { %1739 = vmatpush3.msra.mxu1 %v929_v38 }
  0xeb   :  { %1713 = vmatpush3.bf16.msra.mxu0 %v1997_v26  ;;  %1740 = vmatprep.subr.mxu1 %v2137_v22  ;;  %v1018_v26 = vld [vmem:[#allocation7 + $0x90] sm:$0xff] }
  0xec   :  { %1714 = vmatprep.subr.bf16.mxu0 %v2137_v22  ;;  %1741 = vmatpush3.msra.mxu1 %v928_v39 }
  0xed   :  { %1742 = vmatprep.subr.mxu1 %v2137_v22 }
  0xee   :  { %1743 = vmatpush3.msra.mxu1 %v927_v40 }
  0xef   :  { %1715 = vmatpush3.bf16.msra.mxu0 %v1998_v27  ;;  %1744 = vmatprep.subr.mxu1 %v2137_v22  ;;  %v1017_v27 = vld [vmem:[#allocation7 + $0x88] sm:$0xff] }
  0xf0   :  { %1716 = vmatprep.subr.bf16.mxu0 %v2137_v22  ;;  %1745 = vmatpush3.msra.mxu1 %v926_v41  ;;  %v1120_v41 = vld [vmem:[#allocation7 + $0x140] sm:$0xff] }
  0xf1   :  { %1746 = vmatprep.subr.mxu1 %v2137_v22 }
  0xf2   :  { %1747 = vmatpush3.msra.mxu1 %v925_v42  ;;  %v1119_v42 = vld [vmem:[#allocation7 + $0x138] sm:$0xff] }
  0xf3   :  { %1717 = vmatpush3.bf16.msra.mxu0 %v1999_v28  ;;  %1748 = vmatprep.subr.mxu1 %v2137_v22  ;;  %v1016_v28 = vld [vmem:[#allocation7 + $0x80] sm:$0xff] }
  0xf4   :  { %1718 = vmatprep.subr.bf16.mxu0 %v2137_v22  ;;  %1749 = vmatpush3.msra.mxu1 %v924_v43  ;;  %v1118_v43 = vld [vmem:[#allocation7 + $0x130] sm:$0xff] }
  0xf5   :  { %1750 = vmatprep.subr.mxu1 %v2137_v22 }
  0xf6   :  { %1751 = vmatpush3.msra.mxu1 %v923_v44  ;;  %v1117_v44 = vld [vmem:[#allocation7 + $0x128] sm:$0xff] }
  0xf7   :  { %1719 = vmatpush3.bf16.msra.mxu0 %v2000_v30  ;;  %1752 = vmatprep.subr.mxu1 %v2137_v22  ;;  %v1126_v30 = vld [vmem:[#allocation7 + $0x170] sm:$0xff] }
  0xf8   :  { %1759 = vmatprep.subr.mxu0 %v2137_v22  ;;  %1753 = vmatpush3.msra.mxu1 %v922_v45  ;;  %v1116_v45 = vld [vmem:[#allocation7 + $0x120] sm:$0xff] }
  0xf9   :  { %1754 = vmatprep.subr.mxu1 %v2137_v22 }
  0xfa   :  { %1721 = vmatmul.mubr.msk.bf16.vlgmr.msra.gmra.mxu0 %vm1512_vm2, %v2136_v48  ;;  %1755 = vmatpush3.msra.mxu1 %v921_v46  ;;  %v1030_v48 = vld [vmem:[#allocation7 + $0xf0] sm:$0xff]  ;;  %v1115_v46 = vld [vmem:[#allocation7 + $0x118] sm:$0xff] }
  0xfb   :  { %1791 = vmatprep.mubr.msk.f32.mxu0 %vm2138_vm0, %v2137_v22  ;;  %1794 = vmatprep.subr.mxu1 %v2137_v22 }
  0xfc   :  { %1760 = vmatpush3.msra.mxu0 %v1031_v47  ;;  %v1114_v47 = vld [vmem:[#allocation7 + $0x110] sm:$0xff] }
  0xfd   :  { %1761 = vmatprep.subr.mxu0 %v2137_v22 }
  0xfe   :  { %1762 = vmatpush3.msra.mxu0 %v1030_v48  ;;  %v1113_v48 = vld [vmem:[#allocation7 + $0x108] sm:$0xff] }
  0xff   :  { %1763 = vmatprep.subr.mxu0 %v2137_v22 }
 0x100   :  { %1764 = vmatpush3.msra.mxu0 %v1029_v49  ;;  %v1112_v49 = vld [vmem:[#allocation7 + $0x100] sm:$0xff] }
 0x101   :  { %1765 = vmatprep.subr.mxu0 %v2137_v22 }
 0x102   :  { %1766 = vmatpush3.msra.mxu0 %v1028_v50  ;;  %v1223_v50 = vld [vmem:[#allocation7 + $0x1f8] sm:$0xff] }
 0x103   :  { %1767 = vmatprep.subr.mxu0 %v2137_v22 }
 0x104   :  { %1768 = vmatpush3.msra.mxu0 %v1027_v51  ;;  %v1222_v51 = vld [vmem:[#allocation7 + $0x1f0] sm:$0xff] }
 0x105   :  { %1769 = vmatprep.subr.mxu0 %v2137_v22 }
 0x106   :  { %1770 = vmatpush3.msra.mxu0 %v1026_v52  ;;  %v1221_v52 = vld [vmem:[#allocation7 + $0x1e8] sm:$0xff] }
 0x107   :  { %1771 = vmatprep.subr.mxu0 %v2137_v22 }
 0x108   :  { %1772 = vmatpush3.msra.mxu0 %v1025_v53  ;;  %v1220_v53 = vld [vmem:[#allocation7 + $0x1e0] sm:$0xff] }
 0x109   :  { %1773 = vmatprep.subr.mxu0 %v2137_v22 }
 0x10a   :  { %1774 = vmatpush3.msra.mxu0 %v1024_v19  ;;  %v1311_v19 = vld [vmem:[#allocation8 + $0x40] sm:$0xff] }
 0x10b   :  { %1775 = vmatprep.subr.mxu0 %v2137_v22 }
 0x10c   :  { %1776 = vmatpush3.msra.mxu0 %v1023_v20  ;;  %v1310_v20 = vld [vmem:[#allocation8 + $0x38] sm:$0xff] }
 0x10d   :  { %1777 = vmatprep.subr.mxu0 %v2137_v22 }
 0x10e   :  { %1778 = vmatpush3.msra.mxu0 %v1022_v21  ;;  %v1309_v21 = vld [vmem:[#allocation8 + $0x30] sm:$0xff] }
 0x10f   :  { %1779 = vmatprep.subr.mxu0 %v2137_v22 }
 0x110   :  { %1780 = vmatpush3.msra.mxu0 %v1021_v23  ;;  %v1308_v23 = vld [vmem:[#allocation8 + $0x28] sm:$0xff] }
 0x111   :  { %1781 = vmatprep.subr.mxu0 %v2137_v22 }
 0x112   :  { %1782 = vmatpush3.msra.mxu0 %v1020_v24  ;;  %v1307_v24 = vld [vmem:[#allocation8 + $0x20] sm:$0xff] }
 0x113   :  { %1783 = vmatprep.subr.mxu0 %v2137_v22 }
 0x114   :  { %1784 = vmatpush3.msra.mxu0 %v1019_v25  ;;  %v1306_v25 = vld [vmem:[#allocation8 + $0x18] sm:$0xff] }
 0x115   :  { %1785 = vmatprep.subr.mxu0 %v2137_v22 }
 0x116   :  { %1786 = vmatpush3.msra.mxu0 %v1018_v26  ;;  %v1305_v26 = vld [vmem:[#allocation8 + $0x10] sm:$0xff] }
 0x117   :  { %1787 = vmatprep.subr.mxu0 %v2137_v22 }
 0x118   :  { %1788 = vmatpush3.msra.mxu0 %v1017_v27  ;;  %v1304_v27 = vld [vmem:[#allocation8 + $0x8] sm:$0xff] }
 0x119   :  { %1789 = vmatprep.subr.mxu0 %v2137_v22 }
 0x11a   :  { %1790 = vmatpush3.msra.mxu0 %v1016_v28  ;;  %v1303_v28 = vld [vmem:[#allocation8] sm:$0xff] }
 0x11b   :  { %1829 = vmatprep.subr.mxu0 %v2137_v22 }
 0x179   :  { %v1560_v54 = vpop.f32.mrf.mxu1 }
 0x17a   :  { %v1538_v55 = vpop.f32.mrf.mxu0 }
 0x17b   :  { %v1561_v56 = vpop.f32.mrf.mxu1 }
 0x17c   :  { %v1539_v57 = vpop.f32.mrf.mxu0  ;;  %v1562_v7 = vadd.f32 %v1561_v56, %v1560_v54  ;;  %v1219_v54 = vld [vmem:[#allocation7 + $0x1d8] sm:$0xff]  ;;  %v1217_v56 = vld [vmem:[#allocation7 + $0x1c8] sm:$0xff] }
 0x17d   :  { %v1563_v58 = vpop.f32.mrf.mxu1  ;;  %v1540_v6 = vadd.f32 %v1539_v57, %v1538_v55  ;;  %v1218_v55 = vld [vmem:[#allocation7 + $0x1d0] sm:$0xff]  ;;  %v1516_v57 = vld [vmem:[%s2328_s3 + $0x1] ss:$0 sm:$0xff] }
 0x17e   :  { %v1541_v59 = vpop.f32.mrf.mxu0 }
 0x17f   :  { %v1564_v60 = vpop.f32.mrf.mxu1  ;;  %v795_v9 = vadd.f32 %v1562_v7, %v1540_v6  ;;  %v1208_v6 = vld [vmem:[#allocation7 + $0x180] sm:$0xff]  ;;  %v1318_v7 = vld [vmem:[#allocation8 + $0x78] sm:$0xff] }
 0x180   :  { %v1542_v61 = vpop.f32.mrf.mxu0 }
 0x199   :  { %v1604_v62 = vpop.f32.mrf.mxu1 }
 0x19a   :  { %v1582_v63 = vpop.f32.mrf.mxu0 }
 0x19b   :  { %v1605_v0 = vpop.f32.mrf.mxu1 }
 0x19c   :  { %v1583_v1 = vpop.f32.mrf.mxu0  ;;  %v1606_v11 = vadd.f32 %v1605_v0, %v1604_v62  ;;  %v1216_v62 = vld [vmem:[#allocation7 + $0x1c0] sm:$0xff]  ;;  %v1214_v0 = vld [vmem:[#allocation7 + $0x1b0] sm:$0xff] }
 0x19d   :  { %v1607_v2 = vpop.f32.mrf.mxu1  ;;  %v1584_v8 = vadd.f32 %v1583_v1, %v1582_v63  ;;  %v1215_v63 = vld [vmem:[#allocation7 + $0x1b8] sm:$0xff]  ;;  %v1213_v1 = vld [vmem:[#allocation7 + $0x1a8] sm:$0xff] }
 0x19e   :  { %v1585_v3 = vpop.f32.mrf.mxu0  ;;  %v1212_v2 = vld [vmem:[#allocation7 + $0x1a0] sm:$0xff] }
 0x19f   :  { %v1608_v4 = vpop.f32.mrf.mxu1  ;;  %v835_v10 = vadd.f32 %v1584_v8, %v795_v9  ;;  %v1211_v3 = vld [vmem:[#allocation7 + $0x198] sm:$0xff]  ;;  %v1317_v8 = vld [vmem:[#allocation8 + $0x70] sm:$0xff]  ;;  %v1316_v9 = vld [vmem:[#allocation8 + $0x68] sm:$0xff] }
 0x1a0   :  { %v1586_v5 = vpop.f32.mrf.mxu0  ;;  %v1210_v4 = vld [vmem:[#allocation7 + $0x190] sm:$0xff] }
 0x1a1   :  { %v875_v12 = vadd.f32 %v1606_v11, %v835_v10  ;;  %v1209_v5 = vld [vmem:[#allocation7 + $0x188] sm:$0xff]  ;;  %v1315_v10 = vld [vmem:[#allocation8 + $0x60] sm:$0xff]  ;;  %v1314_v11 = vld [vmem:[#allocation8 + $0x58] sm:$0xff] }
 0x1ba   :  { %v914_v13 = vpop.f32.mrf.mxu0 }
 0x1bb   :  { %v915_v14 = vadd.f32 %v914_v13, %v875_v12  ;;  %v1313_v12 = vld [vmem:[#allocation8 + $0x50] sm:$0xff]  ;;  %v1312_v13 = vld [vmem:[#allocation8 + $0x48] sm:$0xff] }
 0x1bc   :  { %v1722_v15 = vpop.f32.mrf.mxu0 }
 0x1bd   :  { %2001 = vtanh.f32 %v915_v14  ;;  %v1518_v14 = vld [vmem:[%s2328_s3 + $0x2] ss:$0 sm:$0xff] }
 0x1be   :  { %v917_v16 = vpop.f32.mrf.mxu0 }
 0x1c0   :  { %v1723_v17 = vpop.f32.mrf.mxu0 }
 0x1ca   :  { %v2002_v18 = vpop.eup %2001 }
 0x1cb   :  { %1757 = vmatmul.mubr.f32.vlgmr.msra.gmra.mxu1 %v2002_v18 }
 0x1cc   :  { %1826 = vmatprep.mubr.msk.f32.mxu1 %vm2138_vm0, %v2137_v22  ;;  %1795 = vmatpush3.msra.mxu1 %v1127_v29  ;;  %v1520_v29 = vld [vmem:[%s2328_s3 + $0x3] ss:$0 sm:$0xff] }
 0x1cd   :  { %1796 = vmatprep.subr.mxu1 %v2137_v22 }
 0x1ce   :  { %1797 = vmatpush3.msra.mxu1 %v1126_v30 }
 0x1cf   :  { %1798 = vmatprep.subr.mxu1 %v2137_v22 }
 0x1d0   :  { %1799 = vmatpush3.msra.mxu1 %v1125_v31 }
 0x1d1   :  { %1800 = vmatprep.subr.mxu1 %v2137_v22 }
 0x1d2   :  { %1801 = vmatpush3.msra.mxu1 %v1124_v32 }
 0x1d3   :  { %1802 = vmatprep.subr.mxu1 %v2137_v22 }
 0x1d4   :  { %1803 = vmatpush3.msra.mxu1 %v1123_v33 }
 0x1d5   :  { %1804 = vmatprep.subr.mxu1 %v2137_v22 }
 0x1d6   :  { %1805 = vmatpush3.msra.mxu1 %v1122_v34  ;;  %v1521_v34 = vld [vmem:[%s2330_s5] ss:$0 sm:$0xff] }
 0x1d7   :  { %1806 = vmatprep.subr.mxu1 %v2137_v22 }
 0x1d8   :  { %1807 = vmatpush3.msra.mxu1 %v1121_v35 }
 0x1d9   :  { %1808 = vmatprep.subr.mxu1 %v2137_v22 }
 0x1da   :  { %1809 = vmatpush3.msra.mxu1 %v1120_v41 }
 0x1db   :  { %1810 = vmatprep.subr.mxu1 %v2137_v22 }
 0x1dc   :  { %1811 = vmatpush3.msra.mxu1 %v1119_v42 }
 0x1dd   :  { %1812 = vmatprep.subr.mxu1 %v2137_v22 }
 0x1de   :  { %1813 = vmatpush3.msra.mxu1 %v1118_v43 }
 0x1df   :  { %1814 = vmatprep.subr.mxu1 %v2137_v22 }
 0x1e0   :  { %1815 = vmatpush3.msra.mxu1 %v1117_v44 }
 0x1e1   :  { %1816 = vmatprep.subr.mxu1 %v2137_v22 }
 0x1e2   :  { %1817 = vmatpush3.msra.mxu1 %v1116_v45 }
 0x1e3   :  { %1818 = vmatprep.subr.mxu1 %v2137_v22 }
 0x1e4   :  { %1819 = vmatpush3.msra.mxu1 %v1115_v46 }
 0x1e5   :  { %1820 = vmatprep.subr.mxu1 %v2137_v22 }
 0x1e6   :  { %1821 = vmatpush3.msra.mxu1 %v1114_v47 }
 0x1e7   :  { %1822 = vmatprep.subr.mxu1 %v2137_v22 }
 0x1e8   :  { %1823 = vmatpush3.msra.mxu1 %v1113_v48 }
 0x1e9   :  { %1824 = vmatprep.subr.mxu1 %v2137_v22 }
 0x1ea   :  { %1825 = vmatpush3.msra.mxu1 %v1112_v49 }
 0x1eb   :  { %1864 = vmatprep.subr.mxu1 %v2137_v22 }
 0x28b   :  { %v1010_v37 = vpop.f32.mrf.mxu1 }
 0x28c   :  { %v1011_v38 = vadd.f32 %v1514_v36, %v1010_v37 }
 0x28d   :  { %v1758_v39 = vpop.f32.mrf.mxu1 }
 0x28e   :  { %2003 = vtanh.f32 %v1011_v38 }
 0x29b   :  { %v2004_v40 = vpop.eup %2003 }
 0x29c   :  { %1792 = vmatmul.mubr.f32.vlgmr.msra.gmra.mxu0 %v2004_v40 }
 0x29d   :  { %1861 = vmatprep.mubr.msk.f32.mxu0 %vm2138_vm0, %v2137_v22  ;;  %1830 = vmatpush3.msra.mxu0 %v1223_v50 }
 0x29e   :  { %1831 = vmatprep.subr.mxu0 %v2137_v22 }
 0x29f   :  { %1832 = vmatpush3.msra.mxu0 %v1222_v51 }
 0x2a0   :  { %1833 = vmatprep.subr.mxu0 %v2137_v22 }
 0x2a1   :  { %1834 = vmatpush3.msra.mxu0 %v1221_v52 }
 0x2a2   :  { %1835 = vmatprep.subr.mxu0 %v2137_v22 }
 0x2a3   :  { %1836 = vmatpush3.msra.mxu0 %v1220_v53 }
 0x2a4   :  { %1837 = vmatprep.subr.mxu0 %v2137_v22 }
 0x2a5   :  { %1838 = vmatpush3.msra.mxu0 %v1219_v54 }
 0x2a6   :  { %1839 = vmatprep.subr.mxu0 %v2137_v22 }
 0x2a7   :  { %1840 = vmatpush3.msra.mxu0 %v1218_v55 }
 0x2a8   :  { %1841 = vmatprep.subr.mxu0 %v2137_v22 }
 0x2a9   :  { %1842 = vmatpush3.msra.mxu0 %v1217_v56 }
 0x2aa   :  { %1843 = vmatprep.subr.mxu0 %v2137_v22 }
 0x2ab   :  { %1844 = vmatpush3.msra.mxu0 %v1216_v62 }
 0x2ac   :  { %1845 = vmatprep.subr.mxu0 %v2137_v22 }
 0x2ad   :  { %1846 = vmatpush3.msra.mxu0 %v1215_v63 }
 0x2ae   :  { %1847 = vmatprep.subr.mxu0 %v2137_v22 }
 0x2af   :  { %1848 = vmatpush3.msra.mxu0 %v1214_v0 }
 0x2b0   :  { %1849 = vmatprep.subr.mxu0 %v2137_v22 }
 0x2b1   :  { %1850 = vmatpush3.msra.mxu0 %v1213_v1 }
 0x2b2   :  { %1851 = vmatprep.subr.mxu0 %v2137_v22 }
 0x2b3   :  { %1852 = vmatpush3.msra.mxu0 %v1212_v2 }
 0x2b4   :  { %1853 = vmatprep.subr.mxu0 %v2137_v22 }
 0x2b5   :  { %1854 = vmatpush3.msra.mxu0 %v1211_v3 }
 0x2b6   :  { %1855 = vmatprep.subr.mxu0 %v2137_v22 }
 0x2b7   :  { %1856 = vmatpush3.msra.mxu0 %v1210_v4 }
 0x2b8   :  { %1857 = vmatprep.subr.mxu0 %v2137_v22 }
 0x2b9   :  { %1858 = vmatpush3.msra.mxu0 %v1209_v5 }
 0x2ba   :  { %1859 = vmatprep.subr.mxu0 %v2137_v22 }
 0x2bb   :  { %1860 = vmatpush3.msra.mxu0 %v1208_v6 }
 0x35c   :  { %v1106_v58 = vpop.f32.mrf.mxu0 }
 0x35d   :  { %v1107_v59 = vadd.f32 %v1516_v57, %v1106_v58 }
 0x35e   :  { %v1793_v60 = vpop.f32.mrf.mxu0 }
 0x35f   :  { %2005 = vtanh.f32 %v1107_v59 }
 0x36c   :  { %v2006_v61 = vpop.eup %2005 }
 0x36d   :  { %1827 = vmatmul.mubr.f32.vlgmr.msra.gmra.mxu1 %v2006_v61 }
 0x36e   :  { %1896 = vmatprep.mubr.msk.f32.mxu1 %vm2138_vm0, %v2137_v22  ;;  %1865 = vmatpush3.msra.mxu1 %v1318_v7 }
 0x36f   :  { %1866 = vmatprep.subr.mxu1 %v2137_v22 }
 0x370   :  { %1867 = vmatpush3.msra.mxu1 %v1317_v8 }
 0x371   :  { %1868 = vmatprep.subr.mxu1 %v2137_v22 }
 0x372   :  { %1869 = vmatpush3.msra.mxu1 %v1316_v9 }
 0x373   :  { %1870 = vmatprep.subr.mxu1 %v2137_v22 }
 0x374   :  { %1871 = vmatpush3.msra.mxu1 %v1315_v10 }
 0x375   :  { %1872 = vmatprep.subr.mxu1 %v2137_v22 }
 0x376   :  { %1873 = vmatpush3.msra.mxu1 %v1314_v11 }
 0x377   :  { %1874 = vmatprep.subr.mxu1 %v2137_v22 }
 0x378   :  { %1875 = vmatpush3.msra.mxu1 %v1313_v12 }
 0x379   :  { %1876 = vmatprep.subr.mxu1 %v2137_v22 }
 0x37a   :  { %1877 = vmatpush3.msra.mxu1 %v1312_v13 }
 0x37b   :  { %1878 = vmatprep.subr.mxu1 %v2137_v22 }
 0x37c   :  { %1879 = vmatpush3.msra.mxu1 %v1311_v19 }
 0x37d   :  { %1880 = vmatprep.subr.mxu1 %v2137_v22 }
 0x37e   :  { %1881 = vmatpush3.msra.mxu1 %v1310_v20 }
 0x37f   :  { %1882 = vmatprep.subr.mxu1 %v2137_v22 }
 0x380   :  { %1883 = vmatpush3.msra.mxu1 %v1309_v21 }
 0x381   :  { %1884 = vmatprep.subr.mxu1 %v2137_v22 }
 0x382   :  { %1885 = vmatpush3.msra.mxu1 %v1308_v23 }
 0x383   :  { %1886 = vmatprep.subr.mxu1 %v2137_v22 }
 0x384   :  { %1887 = vmatpush3.msra.mxu1 %v1307_v24 }
 0x385   :  { %1888 = vmatprep.subr.mxu1 %v2137_v22 }
 0x386   :  { %1889 = vmatpush3.msra.mxu1 %v1306_v25 }
 0x387   :  { %1890 = vmatprep.subr.mxu1 %v2137_v22 }
 0x388   :  { %1891 = vmatpush3.msra.mxu1 %v1305_v26 }
 0x389   :  { %1892 = vmatprep.subr.mxu1 %v2137_v22 }
 0x38a   :  { %1893 = vmatpush3.msra.mxu1 %v1304_v27 }
 0x38b   :  { %1894 = vmatprep.subr.mxu1 %v2137_v22 }
 0x38c   :  { %1895 = vmatpush3.msra.mxu1 %v1303_v28 }
 0x42d   :  { %v1202_v15 = vpop.f32.mrf.mxu1 }
 0x42e   :  { %v1203_v16 = vadd.f32 %v1518_v14, %v1202_v15 }
 0x42f   :  { %v1828_v17 = vpop.f32.mrf.mxu1 }
 0x430   :  { %2007 = vtanh.f32 %v1203_v16 }
 0x43d   :  { %v2008_v18 = vpop.eup %2007 }
 0x43e   :  { %1862 = vmatmul.mubr.f32.vlgmr.msra.gmra.mxu0 %v2008_v18 }
 0x4fe   :  { %v1298_v30 = vpop.f32.mrf.mxu0 }
 0x4ff   :  { %v1299_v31 = vadd.f32 %v1520_v29, %v1298_v30 }
 0x500   :  { %v1863_v32 = vpop.f32.mrf.mxu0 }
 0x501   :  { %2009 = vtanh.f32 %v1299_v31 }
 0x50e   :  { %v2010_v33 = vpop.eup %2009 }
 0x50f   :  { %1897 = vmatmul.mubr.f32.vlgmr.msra.gmra.mxu1 %v2010_v33 }
 0x5cf   :  { %v1392_v35 = vpop.f32.mrf.mxu1 }
 0x5d0   :  { %v1393_v22 = vadd.f32 %v1521_v34, %v1392_v35 }
 0x5d1   :  { %v1898_v36 = vpop.f32.mrf.mxu1 }
 0x5d2   :  { %1397 = vst.msk [vmem:[#allocation10] sm:$0xff] %vm1396_vm3, %v1393_v22 }
 0x5d3   :  { %2102 = shalt.err (!%p2099_p10)
}
 0x5d4   :  { %1407 = dma.vmem_to_hbm [thread:$0]  %s1405_s28, 128, %s2331_s6, [#allocation4]  }
 0x5d5   :  { %2117 = dma.done.wait [#allocation4], 128  }
 0x5d6   :  { %2118 = vsyncadd [#allocation4], 4294967168 }
 0x5d7   :  { %1411 = vsyncpa [#allocation3], 1 }
 0x5d8   :  { %1412 = vsyncpa [#allocation6], 1 }
 0x5d9   :  { %1413 = vsyncpa [#allocation9], 1 }
 0x5da   :  { %1414 = vsyncpa [#allocation4], 1 }

</bundles_post_ra>
